<compile_context>
chip_gen: v5e
topology: v5e:2x2
jax: 0.10.0
libtpu: 0.0.40
codegen_flags: <defaults>
</compile_context>

<pallas_src>
import functools

import jax
import jax.numpy as jnp
from jax.experimental import pallas as pl
from jax.experimental.pallas import tpu as pltpu


_VMEM_LIMIT = 64 * 1024 * 1024
# Flipped to False at runtime if this Pallas build rejects pl.Buffered(1).
_SINGLE_BUFFER = hasattr(pl, "Buffered")


def _row_tile(n, max_tile):
    """Destination-row tile: whole graph if small, else the largest
    multiple-of-8 divisor of n that is <= max_tile (keeps blocks full)."""
    if n <= max_tile:
        return n
    for t in range(max_tile, 7, -1):
        if n % t == 0 and t % 8 == 0:
            return t
    return max_tile  # ragged edge block; Pallas masks the edge writeback


def _gat_proj_kernel(x_ref, w_ref, y_ref, *, mxu_dtype):
    """Head-fused projection: y = x @ [W_all | W a_l | W a_r]."""
    x = x_ref[...].astype(mxu_dtype)
    w = w_ref[...].astype(mxu_dtype)
    y = jnp.dot(x, w, preferred_element_type=jnp.float32)
    y_ref[...] = y.astype(y_ref.dtype)


def _gat_attn_kernel(adj_ref, proj_ref, projt_ref, bias_ref, out_ref, *,
                     num_heads, head_dim, slope, mxu_dtype):
    """Attention + aggregation for one tile of destination rows (all heads)."""
    hd = num_heads * head_dim
    adj = adj_ref[...] != 0                        # [tm, N]   adj[dst, src]
    proj = proj_ref[...]                           # [N, hd+2H] all source nodes
    feat = proj[:, :hd]                            # [N, H*D]
    el = proj[:, hd:hd + num_heads]                # [N, H]  per-source logits
    er = projt_ref[...][:, hd + num_heads:]        # [tm, H] per-dst logits (tile)
    neg = jnp.float32(-1e30)

    outs = []
    for h in range(num_heads):                     # static unroll, H is small
        e = er[:, h:h + 1] + el[:, h:h + 1].T      # [tm, N] : el[u] + er[v]
        e = jnp.where(e >= 0, e, slope * e)        # LeakyReLU
        e = jnp.where(adj, e, neg)                 # mask non-edges
        m = jnp.max(e, axis=-1, keepdims=True)
        p = jnp.where(adj, jnp.exp(e - m), 0.0)    # f32 softmax numerator
        denom = jnp.sum(p, axis=-1, keepdims=True)
        # zero in-degree rows: alpha := 0, so the output is just the bias
        inv = pl.reciprocal(jnp.where(denom > 0.0, denom, 1.0), approx=True)
        alpha = (p * inv).astype(mxu_dtype)
        fh = feat[:, h * head_dim:(h + 1) * head_dim].astype(mxu_dtype)
        outs.append(jnp.dot(alpha, fh, preferred_element_type=jnp.float32))

    out = outs[0] if num_heads == 1 else jnp.concatenate(outs, axis=-1)
    out_ref[...] = (out + bias_ref[...]).astype(out_ref.dtype)


def _gat_conv_impl(x, adj, w_cat, bias_flat, num_heads, head_dim, slope,
                   mxu_dtype, single_buffer):
    n, f_in = x.shape
    hd = num_heads * head_dim
    cols = hd + 2 * num_heads

    def const_spec(block_shape, index_map):
        # Block index never changes across the grid -> single-buffer it.
        if single_buffer:
            return pl.BlockSpec(block_shape, index_map,
                                pipeline_mode=pl.Buffered(1))
        return pl.BlockSpec(block_shape, index_map)

    # ---- kernel A: head-fused projection ([N, H*D + 2H] slab) -----------
    tm_p = _row_tile(n, 512)
    proj = pl.pallas_call(
        functools.partial(_gat_proj_kernel, mxu_dtype=mxu_dtype),
        out_shape=jax.ShapeDtypeStruct((n, cols), jnp.float32),
        grid_spec=pltpu.PrefetchScalarGridSpec(
            num_scalar_prefetch=0,
            grid=(pl.cdiv(n, tm_p),),
            in_specs=[
                pl.BlockSpec((tm_p, f_in), lambda i: (i, 0)),   # x row tile
                const_spec((f_in, cols), lambda i: (0, 0)),     # fused weights
            ],
            out_specs=pl.BlockSpec((tm_p, cols), lambda i: (i, 0)),
        ),
        compiler_params=pltpu.CompilerParams(
            dimension_semantics=("parallel",),
            vmem_limit_bytes=_VMEM_LIMIT),
    )(x, w_cat)

    # ---- kernel B: attention + aggregation, tiled over dst rows ----------
    tm = _row_tile(n, 256)
    out = pl.pallas_call(
        functools.partial(_gat_attn_kernel, num_heads=num_heads,
                          head_dim=head_dim, slope=slope, mxu_dtype=mxu_dtype),
        out_shape=jax.ShapeDtypeStruct((n, hd), jnp.float32),
        grid_spec=pltpu.PrefetchScalarGridSpec(
            num_scalar_prefetch=0,
            grid=(pl.cdiv(n, tm),),
            in_specs=[
                pl.BlockSpec((tm, n), lambda i: (i, 0)),        # adj rows (int8)
                const_spec((n, cols), lambda i: (0, 0)),        # proj (all src)
                pl.BlockSpec((tm, cols), lambda i: (i, 0)),     # proj (dst rows -> er)
                const_spec((1, hd), lambda i: (0, 0)),          # bias
            ],
            out_specs=pl.BlockSpec((tm, hd), lambda i: (i, 0)),
        ),
        compiler_params=pltpu.CompilerParams(
            dimension_semantics=("parallel",),
            vmem_limit_bytes=_VMEM_LIMIT),
    )(adj, proj, proj, bias_flat)
    return out


def gat_conv(x, adj, w, a_l, a_r, bias, slope, *, mxu_dtype=jnp.bfloat16):
    """One GATConv layer.
    x:[N,F_in] f32, adj:[N,N] int8 (adj[dst,src]!=0 means edge src->dst),
    w:[H,F_in,D], a_l/a_r/bias:[H,1,D].  Returns the flattened [N, H*D]."""
    global _SINGLE_BUFFER
    num_heads, f_in, head_dim = w.shape
    hd = num_heads * head_dim

    # Parameter-only preprocessing (wrapper-side, tiny): fuse the per-head
    # projections into one matmul and fold a_l / a_r into it so that el / er
    # come out of the same MXU pass instead of XLU cross-lane reductions.
    w_all = jnp.transpose(w, (1, 0, 2)).reshape(f_in, hd)     # [F_in, H*D]
    w_al = jnp.einsum("hfd,hd->fh", w, a_l[:, 0, :])          # [F_in, H]
    w_ar = jnp.einsum("hfd,hd->fh", w, a_r[:, 0, :])          # [F_in, H]
    w_cat = jnp.concatenate([w_all, w_al, w_ar], axis=1)      # [F_in, H*D+2H]
    bias_flat = bias.reshape(1, hd)

    if _SINGLE_BUFFER:
        try:
            return _gat_conv_impl(x, adj, w_cat, bias_flat, num_heads,
                                  head_dim, slope, mxu_dtype, True)
        except Exception:  # this Pallas build rejects Buffered(1): fall back
            _SINGLE_BUFFER = False
    return _gat_conv_impl(x, adj, w_cat, bias_flat, num_heads, head_dim,
                          slope, mxu_dtype, False)


def make_gat_params(key, layers, in_dim, hidden, classes, heads):
    """Deterministic parameter init mirroring GAT.__init__ layer shapes."""
    dims_in = [in_dim] + [hidden * heads[l - 1] for l in range(1, layers)]
    dims_in.append(hidden * heads[-2])
    dims_out = [hidden] * layers + [classes]
    params = []
    for l in range(layers + 1):
        key, k1, k2, k3, k4 = jax.random.split(key, 5)
        h, fi, do = heads[l], dims_in[l], dims_out[l]
        scale = 1.0 / jnp.sqrt(jnp.float32(fi))
        params.append(dict(
            w=jax.random.normal(k1, (h, fi, do), jnp.float32) * scale,
            a_l=jax.random.normal(k2, (h, 1, do), jnp.float32) * 0.1,
            a_r=jax.random.normal(k3, (h, 1, do), jnp.float32) * 0.1,
            bias=jax.random.normal(k4, (h, 1, do), jnp.float32) * 0.01,
        ))
    return params


def gat_forward(params, adj, inputs, layers, slope, flag=False):
    """Mirrors GAT.forward (activation = ELU, dropout off, residual off)."""
    x = inputs
    features = []
    for l in range(layers):
        p = params[l]
        # gat_conv already emits the flattened [N, H*D] layout (== .flatten(1))
        x = gat_conv(x, adj, p["w"], p["a_l"], p["a_r"], p["bias"], slope)
        features.append(x)
        x = jax.nn.elu(x)                        # self.activation
    p = params[-1]
    h_last, _, classes = p["w"].shape
    last = gat_conv(x, adj, p["w"], p["a_l"], p["a_r"], p["bias"], slope)
    logits = jnp.mean(last.reshape(-1, h_last, classes), axis=1)   # .mean(1)
    if flag:
        return logits, features
    return logits


if __name__ == "__main__":
    # Small synthetic problem consistent with the module's constructor.
    N = 16              # number of graph nodes
    IN_DIM = 8
    HIDDEN = 8
    CLASSES = 4
    LAYERS = 2
    HEADS = [2, 2, 1]   # len = layers + 1
    SLOPE = 0.2

    # Deterministic graph: self loops + bidirectional ring. adj[dst, src] = 1.
    idx = jnp.arange(N)
    adj = jnp.zeros((N, N), jnp.int8)
    adj = adj.at[idx, idx].set(1)
    adj = adj.at[idx, (idx + 1) % N].set(1)
    adj = adj.at[idx, (idx - 1) % N].set(1)

    key = jax.random.PRNGKey(0)
    k_in, k_par = jax.random.split(key)
    inputs = jax.random.normal(k_in, (N, IN_DIM), jnp.float32)
    params = make_gat_params(k_par, LAYERS, IN_DIM, HIDDEN, CLASSES, HEADS)

    logits = gat_forward(params, adj, inputs, LAYERS, SLOPE)
    jax.block_until_ready(logits)
    assert logits.shape == (N, CLASSES)
    assert bool(jnp.all(jnp.isfinite(logits)))
    print("KERNEL_OK")
</pallas_src>

<mosaic_0001>
module attributes {stable_mosaic.version = 11 : i64} {
  func.func @_gat_proj_kernel(%arg0: i32, %arg1: memref<16x8xf32, #tpu.memory_space<vmem>>, %arg2: memref<8x20xf32, #tpu.memory_space<vmem>>, %arg3: memref<16x20xf32, #tpu.memory_space<vmem>>) attributes {dimension_semantics = [#tpu.dimension_semantics<parallel>], iteration_bounds = array<i64: 1>, scalar_prefetch = 0 : i64, scratch_operands = 0 : i64, tpu.core_type = #tpu.core_type<tc>, window_params = [{transform_indices = @transform_0, window_bounds = array<i64: 16, 8>}, {pipeline_mode = #tpu.pipeline_mode<synchronous>, transform_indices = @transform_1, window_bounds = array<i64: 8, 20>}, {transform_indices = @transform_2, window_bounds = array<i64: 16, 20>}]} {
    %c0 = arith.constant 0 : index
    %c0_0 = arith.constant 0 : index
    %0 = vector.load %arg1[%c0, %c0_0] : memref<16x8xf32, #tpu.memory_space<vmem>>, vector<16x8xf32>
    %1 = arith.truncf %0 : vector<16x8xf32> to vector<16x8xbf16>
    %c0_1 = arith.constant 0 : index
    %c0_2 = arith.constant 0 : index
    %2 = vector.load %arg2[%c0_1, %c0_2] : memref<8x20xf32, #tpu.memory_space<vmem>>, vector<8x20xf32>
    %3 = arith.truncf %2 : vector<8x20xf32> to vector<8x20xbf16>
    %cst = arith.constant dense<0.000000e+00> : vector<16x20xf32>
    %4 = tpu.matmul %1, %3, %cst {dimension_numbers = #tpu.dot_dimension_numbers<[1], [0], [0], [1], [0, 0, 1, 1], [], []>} : vector<16x8xbf16>, vector<8x20xbf16>, vector<16x20xf32> -> vector<16x20xf32>
    %c0_3 = arith.constant 0 : index
    %c0_4 = arith.constant 0 : index
    %5 = vector.load %arg3[%c0_3, %c0_4] : memref<16x20xf32, #tpu.memory_space<vmem>>, vector<16x20xf32>
    tpu.vector_store %arg3[%c0_3, %c0_4], %4 {strides = array<i32>} : memref<16x20xf32, #tpu.memory_space<vmem>>, vector<16x20xf32>,
    return
  }
  func.func @transform_0(%arg0: i32) -> (i32, i32) {
    %c0_i32 = arith.constant 0 : i32
    %c0_i32_0 = arith.constant 0 : i32
    return %arg0, %c0_i32 : i32, i32
  }
  func.func @transform_1(%arg0: i32) -> (i32, i32) {
    %c0_i32 = arith.constant 0 : i32
    %c0_i32_0 = arith.constant 0 : i32
    %c0_i32_1 = arith.constant 0 : i32
    return %c0_i32, %c0_i32_0 : i32, i32
  }
  func.func @transform_2(%arg0: i32) -> (i32, i32) {
    %c0_i32 = arith.constant 0 : i32
    %c0_i32_0 = arith.constant 0 : i32
    return %arg0, %c0_i32 : i32, i32
  }
}

module attributes {stable_mosaic.version = 11 : i64} {
  func.func @_gat_proj_kernel(%arg0: i32, %arg1: memref<16x8xf32, #tpu.memory_space<vmem>>, %arg2: memref<8x20xf32, #tpu.memory_space<vmem>>, %arg3: memref<16x20xf32, #tpu.memory_space<vmem>>) attributes {dimension_semantics = [#tpu.dimension_semantics<parallel>], iteration_bounds = array<i64: 1>, scalar_prefetch = 0 : i64, scratch_operands = 0 : i64, tpu.core_type = #tpu.core_type<tc>, window_params = [{transform_indices = @transform_0, window_bounds = array<i64: 16, 8>}, {pipeline_mode = #tpu.pipeline_mode<synchronous>, transform_indices = @transform_1, window_bounds = array<i64: 8, 20>}, {transform_indices = @transform_2, window_bounds = array<i64: 16, 20>}]} {
    %c0 = arith.constant 0 : index
    %c0_0 = arith.constant 0 : index
    %0 = vector.load %arg1[%c0, %c0_0] : memref<16x8xf32, #tpu.memory_space<vmem>>, vector<16x8xf32>
    %1 = arith.truncf %0 : vector<16x8xf32> to vector<16x8xbf16>
    %c0_1 = arith.constant 0 : index
    %c0_2 = arith.constant 0 : index
    %2 = vector.load %arg2[%c0_1, %c0_2] : memref<8x20xf32, #tpu.memory_space<vmem>>, vector<8x20xf32>
    %3 = arith.truncf %2 : vector<8x20xf32> to vector<8x20xbf16>
    %cst = arith.constant dense<0.000000e+00> : vector<16x20xf32>
    %4 = tpu.matmul %1, %3, %cst {dimension_numbers = #tpu.dot_dimension_numbers<[1], [0], [0], [1], [0, 0, 1, 1], [], []>} : vector<16x8xbf16>, vector<8x20xbf16>, vector<16x20xf32> -> vector<16x20xf32>
    %c0_3 = arith.constant 0 : index
    %c0_4 = arith.constant 0 : index
    %5 = vector.load %arg3[%c0_3, %c0_4] : memref<16x20xf32, #tpu.memory_space<vmem>>, vector<16x20xf32>
    tpu.vector_store %arg3[%c0_3, %c0_4], %4 {strides = array<i32>} : memref<16x20xf32, #tpu.memory_space<vmem>>, vector<16x20xf32>,
    return
  }
  func.func @transform_0(%arg0: i32) -> (i32, i32) {
    %c0_i32 = arith.constant 0 : i32
    %c0_i32_0 = arith.constant 0 : i32
    return %arg0, %c0_i32 : i32, i32
  }
  func.func @transform_1(%arg0: i32) -> (i32, i32) {
    %c0_i32 = arith.constant 0 : i32
    %c0_i32_0 = arith.constant 0 : i32
    %c0_i32_1 = arith.constant 0 : i32
    return %c0_i32, %c0_i32_0 : i32, i32
  }
  func.func @transform_2(%arg0: i32) -> (i32, i32) {
    %c0_i32 = arith.constant 0 : i32
    %c0_i32_0 = arith.constant 0 : i32
    return %arg0, %c0_i32 : i32, i32
  }
}

</mosaic_0001>

<bundles_post_ra>
// kernel: tpu_custom_call.1
= control target key start
LH: loop header
LB: loop body
LE: loop exit
PB: predicated region body
PF: predicated region fallthrough
CT: control target
= control target key end

     0   :  { %vm22_vm0 = vcmask 1043456   ;;  %s121_s0 = inlined_call_operand.vmem [shape: f32[16,8], index: 0, kind: input, shape index: {}]   ;;  %s122_s1 = inlined_call_operand.vmem [shape: f32[8,20], index: 1, kind: input, shape index: {}]   ;;  %s123_s2 = inlined_call_operand.hbm [shape: f32[16,20], index: 2, kind: output, shape index: {}]  }
   0x1   :  { %v16_v0 = vld [vmem:[%s122_s1] sm:$0xff]  ;;  %v14_v2 = vld [vmem:[%s121_s0 + $0x8] sm:$0xff] }
   0x2   :  { %v13_v1 = vld [vmem:[%s121_s0] sm:$0xff]  ;;  %v17_v3 = vpack.c.bf16 %v16_v0, %v16_v0 }
   0x3   :  { %7 = vsyncpa [#allocation3], 0  ;;  %v15_v5 = vpack.c.bf16 %v14_v2, %v13_v1  ;;  %vm18_vm1 = vcmask 64512   ;;  %vm40_vm2 = vcmask 162816   ;;  %s91_s1 = smov [#allocation2]   ;;  %s49_s18 = sshll.u32 %s123_s2, 4  ;;  %s50_s18 = int_to_ptr.hbm [resolvable:$true] %s49_s18 }
   0x4   :  { %v24_v4 = vsel %vm22_vm0, %v17_v3, 0  ;;  %s47_s15 = sshll.u32 %s91_s1, 4  ;;  %s92_s0 = smov 128   ;;  %s48_s15 = int_to_ptr.vmem [resolvable:$true] %s47_s15 }
   0x5   :  { %33 = vmatpush.bf16.msra.mxu0 %v24_v4  ;;  %s93_s19 = smov 8  }
   0x8   :  { %61 = vmatmul.msk.bf16.vlgmr.msra.gmra.mxu0 %vm18_vm1, %v15_v5 }
  0x85   :  { %v35_v6 = vpop.f32.mrf.mxu0 }
  0x86   :  { %41 = vst.msk [vmem:[#allocation2] sm:$0xff] %vm40_vm2, %v35_v6 }
  0x8d   :  { %v37_v7 = vpop.f32.mrf.mxu0 }
  0x8e   :  { %42 = vst.msk [vmem:[#allocation2 + $0x8] sm:$0xff] %vm40_vm2, %v37_v7 }
  0x8f   :  { %55 = dma.vmem_to_hbm [thread:$0]  %s48_s15, 256, %s50_s18, [#allocation3], %s92_s0, %s92_s0, %s93_s19  }
  0x90   :  { %89 = dma.done.wait [#allocation3], 256  }
  0x91   :  { %90 = vsyncadd [#allocation3], 4294967040 }
  0x92   :  { %60 = vsyncpa [#allocation3], 1 }

// kernel: tpu_custom_call.1
= control target key start
LH: loop header
LB: loop body
LE: loop exit
PB: predicated region body
PF: predicated region fallthrough
CT: control target
= control target key end

     0   :  { %vm22_vm0 = vcmask 1043456   ;;  %s121_s0 = inlined_call_operand.vmem [shape: f32[16,8], index: 0, kind: input, shape index: {}]   ;;  %s122_s1 = inlined_call_operand.vmem [shape: f32[8,20], index: 1, kind: input, shape index: {}]   ;;  %s123_s2 = inlined_call_operand.hbm [shape: f32[16,20], index: 2, kind: output, shape index: {}]  }
   0x1   :  { %v16_v0 = vld [vmem:[%s122_s1] sm:$0xff]  ;;  %v14_v2 = vld [vmem:[%s121_s0 + $0x8] sm:$0xff] }
   0x2   :  { %v13_v1 = vld [vmem:[%s121_s0] sm:$0xff]  ;;  %v17_v3 = vpack.c.bf16 %v16_v0, %v16_v0 }
   0x3   :  { %7 = vsyncpa [#allocation3], 0  ;;  %v15_v5 = vpack.c.bf16 %v14_v2, %v13_v1  ;;  %vm18_vm1 = vcmask 64512   ;;  %vm40_vm2 = vcmask 162816   ;;  %s91_s1 = smov [#allocation2]   ;;  %s49_s18 = sshll.u32 %s123_s2, 4  ;;  %s50_s18 = int_to_ptr.hbm [resolvable:$true] %s49_s18 }
   0x4   :  { %v24_v4 = vsel %vm22_vm0, %v17_v3, 0  ;;  %s47_s15 = sshll.u32 %s91_s1, 4  ;;  %s92_s0 = smov 128   ;;  %s48_s15 = int_to_ptr.vmem [resolvable:$true] %s47_s15 }
   0x5   :  { %33 = vmatpush.bf16.msra.mxu0 %v24_v4  ;;  %s93_s19 = smov 8  }
   0x8   :  { %61 = vmatmul.msk.bf16.vlgmr.msra.gmra.mxu0 %vm18_vm1, %v15_v5 }
  0x85   :  { %v35_v6 = vpop.f32.mrf.mxu0 }
  0x86   :  { %41 = vst.msk [vmem:[#allocation2] sm:$0xff] %vm40_vm2, %v35_v6 }
  0x8d   :  { %v37_v7 = vpop.f32.mrf.mxu0 }
  0x8e   :  { %42 = vst.msk [vmem:[#allocation2 + $0x8] sm:$0xff] %vm40_vm2, %v37_v7 }
  0x8f   :  { %55 = dma.vmem_to_hbm [thread:$0]  %s48_s15, 256, %s50_s18, [#allocation3], %s92_s0, %s92_s0, %s93_s19  }
  0x90   :  { %89 = dma.done.wait [#allocation3], 256  }
  0x91   :  { %90 = vsyncadd [#allocation3], 4294967040 }
  0x92   :  { %60 = vsyncpa [#allocation3], 1 }

</bundles_post_ra>
